<compile_context>
chip_gen: v7x
topology: tpu7x:2x2x1
jax: 0.10.0
libtpu: 0.0.40
codegen_flags: <defaults>
</compile_context>

<pallas_src>
import math
import jax
import jax.numpy as jnp
from jax.experimental import pallas as pl
from jax.experimental.pallas import tpu as pltpu

# ---- model hyper-parameters (small, consistent with the module) -------------
IN_DIM = 16
OUT_DIM = 4
ATOM_SIZE = 51
HIDDEN = 128            # fixed by the module definition
BATCH = 2
STD_INIT = 0.5
V_MIN, V_MAX = -10.0, 10.0

LANE = 128              # TPU lane width; each action gets a full 128-lane slab
SUBLANE = 8             # f32 sublane tile; batch padded to a multiple of this
OUT3_PAD = OUT_DIM * LANE           # 512 padded logit columns
NEG_PAD = -1.0e9        # padded-atom logit bias -> exp() underflows to exactly 0


# ---- Pallas kernel -----------------------------------------------------------
def noisy_c51_kernel(x_ref, w1_ref, b1_ref, w2_ref, b2_ref, w3_ref, b3_ref,
                     sup_ref, q_ref):
    # feature layer: Linear(in_dim, 128) + ReLU  (bf16 operands, f32 accumulation)
    h = jnp.dot(x_ref[...], w1_ref[...],
                preferred_element_type=jnp.float32) + b1_ref[...]
    h = jnp.maximum(h, 0.0)                                         # [B_pad, 128]

    # noisy layer 1: Linear(128, 128) with noisy-effective weights + ReLU
    h = jnp.dot(h.astype(jnp.bfloat16), w2_ref[...],
                preferred_element_type=jnp.float32) + b2_ref[...]
    h = jnp.maximum(h, 0.0)                                         # [B_pad, 128]

    # noisy layer 2: Linear(128, out_dim * atom_size), lane-padded to 512 columns.
    # Each action owns a lane-aligned 128-wide slab; atoms 51..127 carry zero
    # weights and a -1e9 bias so they vanish from the softmax.
    qa = jnp.dot(h.astype(jnp.bfloat16), w3_ref[...],
                 preferred_element_type=jnp.float32) + b3_ref[...]  # [B_pad, 512]

    # Per-action softmax over its 128-lane slab (pads exp to exactly 0), then
    # clamp(min=0.001).  OUT_DIM=4 -> static unroll of lane-aligned views
    # (zero-cost slices; reductions go to the XLU, recip to the EUP).
    dists = []
    for a in range(OUT_DIM):
        logits = qa[:, a * LANE:(a + 1) * LANE]                     # aligned view
        m = jnp.max(logits, axis=-1, keepdims=True)
        e = jnp.exp(logits - m)
        s = jnp.sum(e, axis=-1, keepdims=True)
        dists.append(jnp.maximum(e * pl.reciprocal(s, approx=True), 0.001))
    dist_pad = jnp.concatenate(dists, axis=-1)                      # [B_pad, 512]

    # Support-weighted sum as ONE matmul against the block-diagonal support
    # matrix (padded atom rows are 0, so their clamped 0.001 mass contributes
    # nothing).  f32 operands -> near-f32 accuracy; lane-dense (B_pad, 128) out.
    q_ref[...] = jnp.dot(dist_pad, sup_ref[...],
                         preferred_element_type=jnp.float32)


def noisy_c51_forward(x, w1, b1, w2, b2, w3_pad, b3_pad, sup_blk):
    """x: (B, IN_DIM) f32.  Returns q: (B, OUT_DIM) f32."""
    b = x.shape[0]
    b_pad = ((b + SUBLANE - 1) // SUBLANE) * SUBLANE
    x_pad = jnp.zeros((b_pad, IN_DIM), jnp.float32).at[:b].set(x)
    x_pad = x_pad.astype(jnp.bfloat16)

    vm = pl.BlockSpec(memory_space=pltpu.MemorySpace.VMEM)
    q_full = pl.pallas_call(
        noisy_c51_kernel,
        out_shape=jax.ShapeDtypeStruct((b_pad, LANE), jnp.float32),  # lane-dense out
        in_specs=[vm] * 8,
        out_specs=vm,
    )(x_pad, w1, b1, w2, b2, w3_pad, b3_pad, sup_blk)
    return q_full[:b, :OUT_DIM]


# ---- deterministic parameter construction (mirrors the PyTorch __init__) ----
def scale_noise(key, size):
    z = jax.random.normal(key, (size,), dtype=jnp.float32)
    return jnp.sign(z) * jnp.sqrt(jnp.abs(z))


def make_params(key):
    """Raw f32 parameters in (in, out) layout + support vector."""
    ks = jax.random.split(key, 10)

    # feature layer Linear(IN_DIM, HIDDEN)
    r1 = 1.0 / math.sqrt(IN_DIM)
    w1 = jax.random.uniform(ks[0], (IN_DIM, HIDDEN), jnp.float32, -r1, r1)
    b1 = jax.random.uniform(ks[1], (1, HIDDEN), jnp.float32, -r1, r1)

    # NoisyLinear(128, 128): effective weight = mu + sigma * (eps_in ⊗ eps_out)
    r2 = 1.0 / math.sqrt(HIDDEN)
    w2_mu = jax.random.uniform(ks[2], (HIDDEN, HIDDEN), jnp.float32, -r2, r2)
    w2_sigma = jnp.full((HIDDEN, HIDDEN), STD_INIT / math.sqrt(HIDDEN), jnp.float32)
    eps_in2 = scale_noise(ks[3], HIDDEN)
    eps_out2 = scale_noise(ks[4], HIDDEN)
    b2_mu = jax.random.uniform(ks[5], (1, HIDDEN), jnp.float32, -r2, r2)
    b2_sigma = jnp.full((1, HIDDEN), STD_INIT / math.sqrt(HIDDEN), jnp.float32)
    w2 = w2_mu + w2_sigma * jnp.outer(eps_in2, eps_out2)
    b2 = b2_mu + b2_sigma * eps_out2[None, :]

    # NoisyLinear(128, OUT_DIM * ATOM_SIZE)
    out3 = OUT_DIM * ATOM_SIZE
    r3 = 1.0 / math.sqrt(HIDDEN)
    w3_mu = jax.random.uniform(ks[6], (HIDDEN, out3), jnp.float32, -r3, r3)
    w3_sigma = jnp.full((HIDDEN, out3), STD_INIT / math.sqrt(HIDDEN), jnp.float32)
    eps_in3 = scale_noise(ks[7], HIDDEN)
    eps_out3 = scale_noise(ks[8], out3)
    b3_mu = jax.random.uniform(ks[9], (1, out3), jnp.float32, -r3, r3)
    b3_sigma = jnp.full((1, out3), STD_INIT / math.sqrt(out3), jnp.float32)
    w3 = w3_mu + w3_sigma * jnp.outer(eps_in3, eps_out3)
    b3 = b3_mu + b3_sigma * eps_out3[None, :]

    support = jnp.linspace(V_MIN, V_MAX, ATOM_SIZE, dtype=jnp.float32)
    return w1, b1, w2, b2, w3, b3, support


def pack_for_kernel(w1, b1, w2, b2, w3, b3, support):
    """Lane-pad the last layer, build the block-diagonal support matrix, and
    cast matmul weights to bf16.  Done once per noise reset (amortized)."""
    w3_pad = jnp.zeros((HIDDEN, OUT3_PAD), jnp.float32)
    b3_pad = jnp.full((1, OUT3_PAD), NEG_PAD, jnp.float32)
    sup_blk = jnp.zeros((OUT3_PAD, LANE), jnp.float32)
    for a in range(OUT_DIM):
        w3_pad = w3_pad.at[:, a * LANE:a * LANE + ATOM_SIZE].set(
            w3[:, a * ATOM_SIZE:(a + 1) * ATOM_SIZE])
        b3_pad = b3_pad.at[:, a * LANE:a * LANE + ATOM_SIZE].set(
            b3[:, a * ATOM_SIZE:(a + 1) * ATOM_SIZE])
        sup_blk = sup_blk.at[a * LANE:a * LANE + ATOM_SIZE, a].set(support)
    return (w1.astype(jnp.bfloat16), b1,
            w2.astype(jnp.bfloat16), b2,
            w3_pad.astype(jnp.bfloat16), b3_pad,
            sup_blk)


# ---- pure-JAX reference for correctness check --------------------------------
def reference_forward(x, w1, b1, w2, b2, w3, b3, support):
    # Mirrors the kernel's MXU-native precision (bf16 operands, f32 accumulation);
    # softmax / clamp / weighted-sum semantics are exactly the PyTorch module's.
    bf = jnp.bfloat16
    h = jnp.maximum(jnp.dot(x.astype(bf), w1.astype(bf),
                            preferred_element_type=jnp.float32) + b1, 0.0)
    h = jnp.maximum(jnp.dot(h.astype(bf), w2.astype(bf),
                            preferred_element_type=jnp.float32) + b2, 0.0)
    qa = (jnp.dot(h.astype(bf), w3.astype(bf),
                  preferred_element_type=jnp.float32) + b3)
    qa = qa.reshape(-1, OUT_DIM, ATOM_SIZE)
    dist = jax.nn.softmax(qa, axis=-1)
    dist = jnp.maximum(dist, 0.001)                 # clamp(min=0.001)
    return jnp.sum(dist * support[None, None, :], axis=2)


if __name__ == "__main__":
    key = jax.random.PRNGKey(0)
    k_x, k_p = jax.random.split(key)

    x = jax.random.normal(k_x, (BATCH, IN_DIM), dtype=jnp.float32)
    raw_params = make_params(k_p)
    kernel_params = pack_for_kernel(*raw_params)

    q = noisy_c51_forward(x, *kernel_params)
    q = jax.block_until_ready(q)

    q_ref = reference_forward(x, *raw_params)
    assert q.shape == (BATCH, OUT_DIM)
    # tolerance covers the EUP approximate-reciprocal in the in-kernel softmax
    assert jnp.allclose(q, q_ref, atol=5e-3, rtol=5e-3), (q, q_ref)

    print("KERNEL_OK")
</pallas_src>

<mosaic_0001>
module attributes {stable_mosaic.version = 11 : i64} {
  func.func @noisy_c51_kernel(%arg0: memref<8x16xbf16, #tpu.memory_space<vmem>>, %arg1: memref<16x128xbf16, #tpu.memory_space<vmem>>, %arg2: memref<1x128xf32, #tpu.memory_space<vmem>>, %arg3: memref<128x128xbf16, #tpu.memory_space<vmem>>, %arg4: memref<1x128xf32, #tpu.memory_space<vmem>>, %arg5: memref<128x512xbf16, #tpu.memory_space<vmem>>, %arg6: memref<1x512xf32, #tpu.memory_space<vmem>>, %arg7: memref<512x128xf32, #tpu.memory_space<vmem>>, %arg8: memref<8x128xf32, #tpu.memory_space<vmem>>) attributes {dimension_semantics = [], scalar_prefetch = 0 : i64, scratch_operands = 0 : i64, tpu.core_type = #tpu.core_type<tc>} {
    %c0 = arith.constant 0 : index
    %c0_0 = arith.constant 0 : index
    %0 = vector.load %arg0[%c0, %c0_0] : memref<8x16xbf16, #tpu.memory_space<vmem>>, vector<8x16xbf16>
    %c0_1 = arith.constant 0 : index
    %c0_2 = arith.constant 0 : index
    %1 = vector.load %arg1[%c0_1, %c0_2] : memref<16x128xbf16, #tpu.memory_space<vmem>>, vector<16x128xbf16>
    %cst = arith.constant dense<0.000000e+00> : vector<8x128xf32>
    %2 = tpu.matmul %0, %1, %cst {dimension_numbers = #tpu.dot_dimension_numbers<[1], [0], [0], [1], [0, 0, 1, 1], [], []>} : vector<8x16xbf16>, vector<16x128xbf16>, vector<8x128xf32> -> vector<8x128xf32>
    %c0_3 = arith.constant 0 : index
    %c0_4 = arith.constant 0 : index
    %3 = vector.load %arg2[%c0_3, %c0_4] : memref<1x128xf32, #tpu.memory_space<vmem>>, vector<1x128xf32>
    %4 = vector.broadcast %3 : vector<1x128xf32> to vector<8x128xf32>
    %5 = arith.addf %2, %4 : vector<8x128xf32>
    %cst_5 = arith.constant 0.000000e+00 : f32
    %6 = vector.broadcast %cst_5 : f32 to vector<8x128xf32>
    %7 = arith.maximumf %5, %6 : vector<8x128xf32>
    %8 = arith.truncf %7 : vector<8x128xf32> to vector<8x128xbf16>
    %c0_6 = arith.constant 0 : index
    %c0_7 = arith.constant 0 : index
    %9 = vector.load %arg3[%c0_6, %c0_7] : memref<128x128xbf16, #tpu.memory_space<vmem>>, vector<128x128xbf16>
    %cst_8 = arith.constant dense<0.000000e+00> : vector<8x128xf32>
    %10 = tpu.matmul %8, %9, %cst_8 {dimension_numbers = #tpu.dot_dimension_numbers<[1], [0], [0], [1], [0, 0, 1, 1], [], []>} : vector<8x128xbf16>, vector<128x128xbf16>, vector<8x128xf32> -> vector<8x128xf32>
    %c0_9 = arith.constant 0 : index
    %c0_10 = arith.constant 0 : index
    %11 = vector.load %arg4[%c0_9, %c0_10] : memref<1x128xf32, #tpu.memory_space<vmem>>, vector<1x128xf32>
    %12 = vector.broadcast %11 : vector<1x128xf32> to vector<8x128xf32>
    %13 = arith.addf %10, %12 : vector<8x128xf32>
    %cst_11 = arith.constant 0.000000e+00 : f32
    %14 = vector.broadcast %cst_11 : f32 to vector<8x128xf32>
    %15 = arith.maximumf %13, %14 : vector<8x128xf32>
    %16 = arith.truncf %15 : vector<8x128xf32> to vector<8x128xbf16>
    %c0_12 = arith.constant 0 : index
    %c0_13 = arith.constant 0 : index
    %17 = vector.load %arg5[%c0_12, %c0_13] : memref<128x512xbf16, #tpu.memory_space<vmem>>, vector<128x512xbf16>
    %cst_14 = arith.constant dense<0.000000e+00> : vector<8x512xf32>
    %18 = tpu.matmul %16, %17, %cst_14 {dimension_numbers = #tpu.dot_dimension_numbers<[1], [0], [0], [1], [0, 0, 1, 1], [], []>} : vector<8x128xbf16>, vector<128x512xbf16>, vector<8x512xf32> -> vector<8x512xf32>
    %c0_15 = arith.constant 0 : index
    %c0_16 = arith.constant 0 : index
    %19 = vector.load %arg6[%c0_15, %c0_16] : memref<1x512xf32, #tpu.memory_space<vmem>>, vector<1x512xf32>
    %20 = vector.broadcast %19 : vector<1x512xf32> to vector<8x512xf32>
    %21 = arith.addf %18, %20 : vector<8x512xf32>
    %22 = vector.extract_strided_slice %21 {offsets = [0, 0], sizes = [8, 128], strides = [1, 1]} : vector<8x512xf32> to vector<8x128xf32>
    %cst_17 = arith.constant dense<0xFF800000> : vector<8xf32>
    %23 = vector.multi_reduction <maximumf>, %22, %cst_17 [1] : vector<8x128xf32> to vector<8xf32>
    %24 = vector.shape_cast %23 : vector<8xf32> to vector<8x1xf32>
    %25 = vector.broadcast %24 : vector<8x1xf32> to vector<8x128xf32>
    %26 = arith.subf %22, %25 : vector<8x128xf32>
    %27 = math.exp %26 : vector<8x128xf32>
    %cst_18 = arith.constant dense<0.000000e+00> : vector<8xf32>
    %28 = vector.multi_reduction <add>, %27, %cst_18 [1] : vector<8x128xf32> to vector<8xf32>
    %29 = vector.shape_cast %28 : vector<8xf32> to vector<8x1xf32>
    %30 = tpu.reciprocal %29 {approx = true} : vector<8x1xf32> -> vector<8x1xf32>
    %31 = vector.broadcast %30 : vector<8x1xf32> to vector<8x128xf32>
    %32 = arith.mulf %27, %31 : vector<8x128xf32>
    %cst_19 = arith.constant 1.000000e-03 : f32
    %33 = vector.broadcast %cst_19 : f32 to vector<8x128xf32>
    %34 = arith.maximumf %32, %33 : vector<8x128xf32>
    %35 = vector.extract_strided_slice %21 {offsets = [0, 128], sizes = [8, 128], strides = [1, 1]} : vector<8x512xf32> to vector<8x128xf32>
    %cst_20 = arith.constant dense<0xFF800000> : vector<8xf32>
    %36 = vector.multi_reduction <maximumf>, %35, %cst_20 [1] : vector<8x128xf32> to vector<8xf32>
    %37 = vector.shape_cast %36 : vector<8xf32> to vector<8x1xf32>
    %38 = vector.broadcast %37 : vector<8x1xf32> to vector<8x128xf32>
    %39 = arith.subf %35, %38 : vector<8x128xf32>
    %40 = math.exp %39 : vector<8x128xf32>
    %cst_21 = arith.constant dense<0.000000e+00> : vector<8xf32>
    %41 = vector.multi_reduction <add>, %40, %cst_21 [1] : vector<8x128xf32> to vector<8xf32>
    %42 = vector.shape_cast %41 : vector<8xf32> to vector<8x1xf32>
    %43 = tpu.reciprocal %42 {approx = true} : vector<8x1xf32> -> vector<8x1xf32>
    %44 = vector.broadcast %43 : vector<8x1xf32> to vector<8x128xf32>
    %45 = arith.mulf %40, %44 : vector<8x128xf32>
    %cst_22 = arith.constant 1.000000e-03 : f32
    %46 = vector.broadcast %cst_22 : f32 to vector<8x128xf32>
    %47 = arith.maximumf %45, %46 : vector<8x128xf32>
    %48 = vector.extract_strided_slice %21 {offsets = [0, 256], sizes = [8, 128], strides = [1, 1]} : vector<8x512xf32> to vector<8x128xf32>
    %cst_23 = arith.constant dense<0xFF800000> : vector<8xf32>
    %49 = vector.multi_reduction <maximumf>, %48, %cst_23 [1] : vector<8x128xf32> to vector<8xf32>
    %50 = vector.shape_cast %49 : vector<8xf32> to vector<8x1xf32>
    %51 = vector.broadcast %50 : vector<8x1xf32> to vector<8x128xf32>
    %52 = arith.subf %48, %51 : vector<8x128xf32>
    %53 = math.exp %52 : vector<8x128xf32>
    %cst_24 = arith.constant dense<0.000000e+00> : vector<8xf32>
    %54 = vector.multi_reduction <add>, %53, %cst_24 [1] : vector<8x128xf32> to vector<8xf32>
    %55 = vector.shape_cast %54 : vector<8xf32> to vector<8x1xf32>
    %56 = tpu.reciprocal %55 {approx = true} : vector<8x1xf32> -> vector<8x1xf32>
    %57 = vector.broadcast %56 : vector<8x1xf32> to vector<8x128xf32>
    %58 = arith.mulf %53, %57 : vector<8x128xf32>
    %cst_25 = arith.constant 1.000000e-03 : f32
    %59 = vector.broadcast %cst_25 : f32 to vector<8x128xf32>
    %60 = arith.maximumf %58, %59 : vector<8x128xf32>
    %61 = vector.extract_strided_slice %21 {offsets = [0, 384], sizes = [8, 128], strides = [1, 1]} : vector<8x512xf32> to vector<8x128xf32>
    %cst_26 = arith.constant dense<0xFF800000> : vector<8xf32>
    %62 = vector.multi_reduction <maximumf>, %61, %cst_26 [1] : vector<8x128xf32> to vector<8xf32>
    %63 = vector.shape_cast %62 : vector<8xf32> to vector<8x1xf32>
    %64 = vector.broadcast %63 : vector<8x1xf32> to vector<8x128xf32>
    %65 = arith.subf %61, %64 : vector<8x128xf32>
    %66 = math.exp %65 : vector<8x128xf32>
    %cst_27 = arith.constant dense<0.000000e+00> : vector<8xf32>
    %67 = vector.multi_reduction <add>, %66, %cst_27 [1] : vector<8x128xf32> to vector<8xf32>
    %68 = vector.shape_cast %67 : vector<8xf32> to vector<8x1xf32>
    %69 = tpu.reciprocal %68 {approx = true} : vector<8x1xf32> -> vector<8x1xf32>
    %70 = vector.broadcast %69 : vector<8x1xf32> to vector<8x128xf32>
    %71 = arith.mulf %66, %70 : vector<8x128xf32>
    %cst_28 = arith.constant 1.000000e-03 : f32
    %72 = vector.broadcast %cst_28 : f32 to vector<8x128xf32>
    %73 = arith.maximumf %71, %72 : vector<8x128xf32>
    %74 = tpu.concatenate %34, %47, %60, %73 in 1 : vector<8x128xf32>, vector<8x128xf32>, vector<8x128xf32>, vector<8x128xf32> -> vector<8x512xf32>
    %c0_29 = arith.constant 0 : index
    %c0_30 = arith.constant 0 : index
    %75 = vector.load %arg7[%c0_29, %c0_30] : memref<512x128xf32, #tpu.memory_space<vmem>>, vector<512x128xf32>
    %cst_31 = arith.constant dense<0.000000e+00> : vector<8x128xf32>
    %76 = tpu.matmul %74, %75, %cst_31 {dimension_numbers = #tpu.dot_dimension_numbers<[1], [0], [0], [1], [0, 0, 1, 1], [], []>} : vector<8x512xf32>, vector<512x128xf32>, vector<8x128xf32> -> vector<8x128xf32>
    %c0_32 = arith.constant 0 : index
    %c0_33 = arith.constant 0 : index
    %77 = vector.load %arg8[%c0_32, %c0_33] : memref<8x128xf32, #tpu.memory_space<vmem>>, vector<8x128xf32>
    tpu.vector_store %arg8[%c0_32, %c0_33], %76 {strides = array<i32>} : memref<8x128xf32, #tpu.memory_space<vmem>>, vector<8x128xf32>,
    return
  }
}

</mosaic_0001>

<bundles_post_ra>
// kernel: tpu_custom_call.1
= control target key start
LH: loop header
LB: loop body
LE: loop exit
PB: predicated region body
PF: predicated region fallthrough
CT: control target
= control target key end

     0   :  { %13 = vsyncpa [#allocation3], 0  ;;  %s1455_s0 = inlined_call_operand.hbm [shape: bf16[8,16], index: 0, kind: input, shape index: {}]   ;;  %s1456_s1 = inlined_call_operand.hbm [shape: bf16[16,128], index: 1, kind: input, shape index: {}]   ;;  %s1457_s2 = inlined_call_operand.vmem [shape: f32[1,128], index: 2, kind: input, shape index: {}]   ;;  %s1458_s3 = inlined_call_operand.hbm [shape: bf16[128,128], index: 3, kind: input, shape index: {}]   ;;  %s1459_s4 = inlined_call_operand.vmem [shape: f32[1,128], index: 4, kind: input, shape index: {}]   ;;  %s1460_s5 = inlined_call_operand.hbm [shape: bf16[128,512], index: 5, kind: input, shape index: {}]   ;;  %s1461_s6 = inlined_call_operand.vmem [shape: f32[1,512], index: 6, kind: input, shape index: {}]   ;;  %s1462_s7 = inlined_call_operand.hbm [shape: f32[512,128], index: 7, kind: input, shape index: {}]   ;;  %s1463_s8 = inlined_call_operand.hbm [shape: f32[8,128], index: 8, kind: output, shape index: {}]  }
   0x1   :  { %14 = vsyncpa [#allocation6], 0 }
   0x2   :  { %15 = vsyncpa [#allocation9], 0 }
   0x3   :  { %16 = vsyncpa [#allocation4], 0  ;;  %s1273_s27 = smov [#allocation5]   ;;  %s1133_s9 = scalar_lea.hbm %s1456_s1, 128 }
   0x4   :  { %s32_s28 = sshll.u32 %s1273_s27, 4  ;;  %p1134_p0 = scmp.ne.s32.totalorder %s1456_s1, %s1133_s9  ;;  %s33_s28 = int_to_ptr.vmem [resolvable:$true] %s32_s28 }
   0x5   :  { %p1137_p1 = scmp.lt.u32.totalorder %s1133_s9, %s1456_s1 }
   0x7   :  { %p1139_p2 = pnand %p1137_p1, %p1134_p0 }
   0x9   :  { %1142 = shalt.err (!%p1139_p2)
}
   0xa   :  { %s1143_s14 = scalar_lea.vmem %s33_s28, 128  ;;  %p1148_p4 = scmp.lt.s32.totalorder %s33_s28, %s33_s28 }
   0xb   :  { %p1144_p3 = scmp.ne.s32.totalorder %s33_s28, %s1143_s14  ;;  %p1149_p5 = scmp.lt.s32.totalorder %s1143_s14, %s1143_s14 }
   0xd   :  { %p1150_p6 = por %p1149_p5, %p1148_p4 }
   0xf   :  { %p1151_p7 = pnand %p1150_p6, %p1144_p3 }
  0x11   :  { %1154 = shalt.err (!%p1151_p7)
}
  0x12   :  { %s1274_s15 = smov 64   ;;  %s1275_s16 = smov 4  }
  0x13   :  { %38 = dma.hbm_to_vmem [thread:$0]  %s1456_s1, 128, %s33_s28, [#allocation6], %s1274_s15, %s1274_s15, %s1275_s16  }
  0x14   :  { %s1276_s19 = smov [#allocation8]   ;;  %s1155_s23 = scalar_lea.hbm %s1460_s5, 4096 }
  0x15   :  { %s60_s20 = sshll.u32 %s1276_s19, 4  ;;  %p1156_p8 = scmp.ne.s32.totalorder %s1460_s5, %s1155_s23  ;;  %s61_s20 = int_to_ptr.vmem [resolvable:$true] %s60_s20 }
  0x16   :  { %p1159_p9 = scmp.lt.u32.totalorder %s1155_s23, %s1460_s5 }
  0x18   :  { %p1161_p10 = pnand %p1159_p9, %p1156_p8 }
  0x1a   :  { %1164 = shalt.err (!%p1161_p10)
}
  0x1b   :  { %s1165_s29 = scalar_lea.vmem %s61_s20, 4096  ;;  %p1170_p12 = scmp.lt.s32.totalorder %s61_s20, %s61_s20 }
  0x1c   :  { %p1166_p11 = scmp.ne.s32.totalorder %s61_s20, %s1165_s29  ;;  %p1171_p13 = scmp.lt.s32.totalorder %s1165_s29, %s1165_s29 }
  0x1e   :  { %p1172_p0 = por %p1171_p13, %p1170_p12 }
  0x20   :  { %p1173_p1 = pnand %p1172_p0, %p1166_p11 }
  0x22   :  { %1176 = shalt.err (!%p1173_p1)
}
  0x23   :  { %s1277_s1 = smov 256   ;;  %s1278_s28 = smov 16  }
  0x24   :  { %66 = dma.hbm_to_vmem [thread:$0]  %s1460_s5, 4096, %s61_s20, [#allocation9], %s1277_s1, %s1277_s1, %s1278_s28  }
  0x25   :  { %s1279_s10 = smov [#allocation2]   ;;  %s1280_s12 = smov [#allocation7]  }
  0x26   :  { %s23_s11 = sshll.u32 %s1279_s10, 4  ;;  %s46_s13 = sshll.u32 %s1280_s12, 4  ;;  %s24_s11 = int_to_ptr.vmem [resolvable:$true] %s23_s11  ;;  %s1360_s13 = int_to_ptr.vmem [resolvable:$true] %s46_s13 }
  0x27   :  { %s1177_s18 = scalar_lea.hbm %s1455_s0, 64 }
  0x28   :  { %p1178_p2 = scmp.ne.s32.totalorder %s1455_s0, %s1177_s18  ;;  %p1181_p3 = scmp.lt.u32.totalorder %s1177_s18, %s1455_s0 }
  0x2a   :  { %p1183_p4 = pnand %p1181_p3, %p1178_p2 }
  0x2c   :  { %1186 = shalt.err (!%p1183_p4)
}
  0x2d   :  { %s1187_s5 = scalar_lea.vmem %s24_s11, 64  ;;  %p1192_p6 = scmp.lt.s32.totalorder %s24_s11, %s24_s11 }
  0x2e   :  { %p1188_p5 = scmp.ne.s32.totalorder %s24_s11, %s1187_s5  ;;  %p1193_p7 = scmp.lt.s32.totalorder %s1187_s5, %s1187_s5 }
  0x30   :  { %p1194_p8 = por %p1193_p7, %p1192_p6 }
  0x32   :  { %p1195_p9 = pnand %p1194_p8, %p1188_p5 }
  0x34   :  { %1198 = shalt.err (!%p1195_p9)
}
  0x35   :  { %26 = dma.hbm_to_vmem [thread:$0]  %s1455_s0, 64, %s24_s11, [#allocation3]  }
  0x36   :  { %s1199_s27 = scalar_lea.hbm %s1458_s3, 1024 }
  0x37   :  { %p1200_p10 = scmp.ne.s32.totalorder %s1458_s3, %s1199_s27  ;;  %p1203_p11 = scmp.lt.u32.totalorder %s1199_s27, %s1458_s3 }
  0x39   :  { %p1205_p12 = pnand %p1203_p11, %p1200_p10 }
  0x3b   :  { %1208 = shalt.err (!%p1205_p12)
}
  0x3c   :  { %s1209_s9 = scalar_lea.vmem %s1360_s13, 1024  ;;  %p1214_p0 = scmp.lt.s32.totalorder %s1360_s13, %s1360_s13 }
  0x3d   :  { %p1210_p13 = scmp.ne.s32.totalorder %s1360_s13, %s1209_s9  ;;  %p1215_p1 = scmp.lt.s32.totalorder %s1209_s9, %s1209_s9 }
  0x3f   :  { %p1216_p2 = por %p1215_p1, %p1214_p0 }
  0x41   :  { %p1217_p3 = pnand %p1216_p2, %p1210_p13 }
  0x43   :  { %1220 = shalt.err (!%p1217_p3)
}
  0x44   :  { %52 = dma.hbm_to_vmem [thread:$0]  %s1458_s3, 1024, %s1360_s13, [#allocation6], %s1274_s15, %s1274_s15, %s1275_s16  }
  0x45   :  { %s1281_s11 = smov [#allocation10]   ;;  %s1221_s18 = scalar_lea.hbm %s1462_s7, 8192 }
  0x46   :  { %s74_s12 = sshll.u32 %s1281_s11, 4  ;;  %p1222_p4 = scmp.ne.s32.totalorder %s1462_s7, %s1221_s18  ;;  %s75_s12 = int_to_ptr.vmem [resolvable:$true] %s74_s12 }
  0x47   :  { %p1225_p5 = scmp.lt.u32.totalorder %s1221_s18, %s1462_s7 }
  0x49   :  { %p1227_p6 = pnand %p1225_p5, %p1222_p4 }
  0x4b   :  { %1230 = shalt.err (!%p1227_p6)
}
  0x4c   :  { %s1231_s5 = scalar_lea.vmem %s75_s12, 8192  ;;  %p1236_p8 = scmp.lt.s32.totalorder %s75_s12, %s75_s12 }
  0x4d   :  { %p1232_p7 = scmp.ne.s32.totalorder %s75_s12, %s1231_s5  ;;  %p1237_p9 = scmp.lt.s32.totalorder %s1231_s5, %s1231_s5 }
  0x4f   :  { %p1238_p10 = por %p1237_p9, %p1236_p8 }
  0x51   :  { %p1239_p11 = pnand %p1238_p10, %p1232_p7 }
  0x53   :  { %1242 = shalt.err (!%p1239_p11)
}
  0x54   :  { %s1282_s3 = smov 128   ;;  %s1283_s15 = smov 8  }
  0x55   :  { %80 = dma.hbm_to_vmem [thread:$0]  %s1462_s7, 8192, %s75_s12, [#allocation9], %s1282_s3, %s1282_s3, %s1283_s15  }
  0x56   :  { %1265 = dma.done.wait [#allocation3], 64  }
  0x57   :  { %1266 = vsyncadd [#allocation3], 4294967232 }
  0x58   :  { %1267 = dma.done.wait [#allocation6], 1152  }
  0x59   :  { %1268 = vsyncadd [#allocation6], 4294966144 }
  0x5a   :  { %1269 = dma.done.wait [#allocation9], 12288  }
  0x5b   :  { %1270 = vsyncadd [#allocation9], 4294955008  ;;  %v1284_v0 = vmov 0.0   ;;  %vm1285_vm0 = vmmov 0   ;;  %v1060_v1 = vld [vmem:[#allocation5] sm:$0xff]   ;;  %vm113_vm1 = vcmask 130048   ;;  %v306_v60 = vlaneseq }
  0x5c   :  { %955 = vmatprep.subr.bf16.mxu0 %v1284_v0  ;;  %957 = vmatprep.mubr.msk.bf16.mxu0 %vm1285_vm0, %v1284_v0  ;;  %v97_v2 = vld [vmem:[#allocation2] sm:$0xf]  ;;  %v1061_v3 = vld [vmem:[#allocation7] sm:$0xff]   ;;  %v1062_v4 = vld [vmem:[#allocation7 + $0x8] sm:$0xff]   ;;  %v1286_v51 = vmov 0  }
  0x5d   :  { %961 = vmatprep.subr.bf16.mxu1 %v1284_v0  ;;  %977 = vmatprep.mubr.msk.bf16.mxu1 %vm1285_vm0, %v1284_v0  ;;  %v1063_v5 = vld [vmem:[#allocation7 + $0x10] sm:$0xff]   ;;  %v1064_v6 = vld [vmem:[#allocation7 + $0x18] sm:$0xff]   ;;  %v1065_v7 = vld [vmem:[#allocation7 + $0x20] sm:$0xff]   ;;  %v307_v61 = vshrl.u32 %v306_v60, 7 }
  0x5e   :  { %956 = vmatpush3.bf16.msra.mxu0 %v1060_v1  ;;  %962 = vmatpush3.bf16.msra.mxu1 %v1061_v3  ;;  %v1066_v8 = vld [vmem:[#allocation7 + $0x28] sm:$0xff]   ;;  %v1067_v9 = vld [vmem:[#allocation7 + $0x30] sm:$0xff]   ;;  %v1068_v10 = vld [vmem:[#allocation7 + $0x38] sm:$0xff]  }
  0x5f   :  { %963 = vmatprep.subr.bf16.mxu1 %v1284_v0  ;;  %v1069_v11 = vld [vmem:[#allocation8] ss:$16 sps:$4 sm:$0xff]   ;;  %v1071_v12 = vld [vmem:[#allocation8 + $0x4] ss:$16 sps:$4 sm:$0xff]   ;;  %v1074_v13 = vld [vmem:[#allocation8 + $0xc] ss:$16 sps:$4 sm:$0xff]  }
  0x60   :  { %v1077_v14 = vld [vmem:[#allocation8 + $0x24] ss:$16 sps:$4 sm:$0xff]   ;;  %486 = vmatprep.subr.bf16.mxu0 %v1071_v12  ;;  %v1075_v15 = vld [vmem:[#allocation8 + $0x20] ss:$16 sps:$4 sm:$0xff]   ;;  %v1072_v33 = vld [vmem:[#allocation8 + $0x8] ss:$16 sps:$4 sm:$0xff]  }
  0x61   :  { %958 = vmatmul.mubr.msk.bf16.vlgmr.msra.gmra.mrb[0].mxu0 %vm113_vm1, %v97_v2  ;;  %v1083_v16 = vld [vmem:[#allocation8 + $0x44] ss:$16 sps:$4 sm:$0xff]   ;;  %v1081_v17 = vld [vmem:[#allocation8 + $0x40] ss:$16 sps:$4 sm:$0xff]   ;;  %v1080_v35 = vld [vmem:[#allocation8 + $0x2c] ss:$16 sps:$4 sm:$0xff]  }
  0x62   :  { %964 = vmatpush3.bf16.msra.mxu1 %v1062_v4  ;;  %487 = vmatpush1.bf16.msra.mxu0 %v1069_v11  ;;  %v1089_v18 = vld [vmem:[#allocation8 + $0x64] ss:$16 sps:$4 sm:$0xff]   ;;  %v1087_v19 = vld [vmem:[#allocation8 + $0x60] ss:$16 sps:$4 sm:$0xff]   ;;  %v1078_v36 = vld [vmem:[#allocation8 + $0x28] ss:$16 sps:$4 sm:$0xff]  }
  0x63   :  { %965 = vmatprep.subr.bf16.mxu1 %v1284_v0  ;;  %488 = vmatprep.subr.bf16.mxu0 %v1077_v14  ;;  %v1095_v20 = vld [vmem:[#allocation8 + $0x84] ss:$16 sps:$4 sm:$0xff]   ;;  %v1093_v21 = vld [vmem:[#allocation8 + $0x80] ss:$16 sps:$4 sm:$0xff]   ;;  %v1086_v37 = vld [vmem:[#allocation8 + $0x4c] ss:$16 sps:$4 sm:$0xff]  }
  0x64   :  { %v1101_v22 = vld [vmem:[#allocation8 + $0xa4] ss:$16 sps:$4 sm:$0xff]   ;;  %v1099_v23 = vld [vmem:[#allocation8 + $0xa0] ss:$16 sps:$4 sm:$0xff]   ;;  %v1084_v38 = vld [vmem:[#allocation8 + $0x48] ss:$16 sps:$4 sm:$0xff]   ;;  %518 = vmatprep.mubr.bf16.mxu0 %v1286_v51 }
  0x65   :  { %v1107_v24 = vld [vmem:[#allocation8 + $0xc4] ss:$16 sps:$4 sm:$0xff]   ;;  %v1105_v25 = vld [vmem:[#allocation8 + $0xc0] ss:$16 sps:$4 sm:$0xff]   ;;  %v1092_v39 = vld [vmem:[#allocation8 + $0x6c] ss:$16 sps:$4 sm:$0xff]  }
  0x66   :  { %966 = vmatpush3.bf16.msra.mxu1 %v1063_v5  ;;  %489 = vmatpush1.bf16.msra.mxu0 %v1075_v15  ;;  %v830_v26 = vld [vmem:[%s1457_s2] ss:$0 sm:$0xff]  ;;  %v1090_v40 = vld [vmem:[#allocation8 + $0x68] ss:$16 sps:$4 sm:$0xff]   ;;  %v1098_v41 = vld [vmem:[#allocation8 + $0x8c] ss:$16 sps:$4 sm:$0xff]  }
  0x67   :  { %967 = vmatprep.subr.bf16.mxu1 %v1284_v0  ;;  %490 = vmatprep.subr.bf16.mxu0 %v1083_v16  ;;  %v1096_v42 = vld [vmem:[#allocation8 + $0x88] ss:$16 sps:$4 sm:$0xff]   ;;  %v1104_v43 = vld [vmem:[#allocation8 + $0xac] ss:$16 sps:$4 sm:$0xff]   ;;  %v1113_v47 = vld [vmem:[#allocation8 + $0xe4] ss:$16 sps:$4 sm:$0xff]  }
  0x68   :  { %v1102_v44 = vld [vmem:[#allocation8 + $0xa8] ss:$16 sps:$4 sm:$0xff]   ;;  %v1110_v45 = vld [vmem:[#allocation8 + $0xcc] ss:$16 sps:$4 sm:$0xff]   ;;  %v1111_v49 = vld [vmem:[#allocation8 + $0xe0] ss:$16 sps:$4 sm:$0xff]  }
  0x69   :  { %v1108_v46 = vld [vmem:[#allocation8 + $0xc8] ss:$16 sps:$4 sm:$0xff]   ;;  %v1116_v48 = vld [vmem:[#allocation8 + $0xec] ss:$16 sps:$4 sm:$0xff]   ;;  %v833_v52 = vld [vmem:[%s1459_s4] ss:$0 sm:$0xff] }
  0x6a   :  { %968 = vmatpush3.bf16.msra.mxu1 %v1064_v6  ;;  %491 = vmatpush1.bf16.msra.mxu0 %v1081_v17  ;;  %v1114_v50 = vld [vmem:[#allocation8 + $0xe8] ss:$16 sps:$4 sm:$0xff]   ;;  %v308_v62 = vsub.s32 0, %v307_v61  ;;  %v304_v63 = vld [vmem:[%s1461_s6] sm:$0xf]  ;;  %v316_v2 = vsub.s32 2, %v307_v61 }
  0x6b   :  { %969 = vmatprep.subr.bf16.mxu1 %v1284_v0  ;;  %492 = vmatprep.subr.bf16.mxu0 %v1089_v18  ;;  %v320_v4 = vsub.s32 3, %v307_v61  ;;  %s1287_s4 = smov [#allocation11]  }
  0x6c   :  { %v309_v1 = vrot.slane %v304_v63, %v308_v62  ;;  %s819_s6 = sshll.u32 %s1287_s4, 4  ;;  %s820_s6 = int_to_ptr.vmem [resolvable:$true] %s819_s6 }
  0x6d   :  { %v321_v12 = vrot.slane %v304_v63, %v320_v4  ;;  %s1243_s27 = scalar_lea.vmem %s820_s6, 128  ;;  %p1248_p13 = scmp.lt.s32.totalorder %s820_s6, %s820_s6 }
  0x6e   :  { %970 = vmatpush3.bf16.msra.mxu1 %v1065_v7  ;;  %493 = vmatpush1.bf16.msra.mxu0 %v1087_v19  ;;  %v624_v19 = vld [vmem:[#allocation10 + $0x80] sm:$0xff]  ;;  %p1244_p12 = scmp.ne.s32.totalorder %s820_s6, %s1243_s27  ;;  %p1249_p0 = scmp.lt.s32.totalorder %s1243_s27, %s1243_s27 }
  0x6f   :  { %971 = vmatprep.subr.bf16.mxu1 %v1284_v0  ;;  %494 = vmatprep.subr.bf16.mxu0 %v1095_v20  ;;  %v625_v20 = vld [vmem:[#allocation10 + $0x88] sm:$0xff] }
  0x70   :  { %p1250_p1 = por %p1249_p0, %p1248_p13 }
  0x72   :  { %972 = vmatpush3.bf16.msra.mxu1 %v1066_v8  ;;  %495 = vmatpush1.bf16.msra.mxu0 %v1093_v21  ;;  %v317_v8 = vrot.slane %v304_v63, %v316_v2  ;;  %v608_v21 = vld [vmem:[#allocation10] sm:$0xff]  ;;  %p1251_p2 = pnand %p1250_p1, %p1244_p12 }
  0x73   :  { %973 = vmatprep.subr.bf16.mxu1 %v1284_v0  ;;  %496 = vmatprep.subr.bf16.mxu0 %v1101_v22  ;;  %v981_v22 = vpack.c.bf16 %v625_v20, %v624_v19  ;;  %v616_v19 = vld [vmem:[#allocation10 + $0x40] sm:$0xff]  ;;  %v617_v20 = vld [vmem:[#allocation10 + $0x48] sm:$0xff] }
  0x76   :  { %974 = vmatpush3.bf16.msra.mxu1 %v1067_v9  ;;  %497 = vmatpush1.bf16.msra.mxu0 %v1099_v23  ;;  %v609_v23 = vld [vmem:[#allocation10 + $0x8] sm:$0xff] }
  0x77   :  { %975 = vmatprep.subr.bf16.mxu1 %v1284_v0  ;;  %498 = vmatprep.subr.bf16.mxu0 %v1107_v24  ;;  %v312_v0 = vsub.s32 1, %v307_v61  ;;  %v626_v24 = vld [vmem:[#allocation10 + $0x90] sm:$0xff] }
  0x79   :  { %v313_v3 = vrot.slane %v304_v63, %v312_v0 }
  0x7a   :  { %976 = vmatpush3.bf16.msra.mxu1 %v1068_v10  ;;  %499 = vmatpush1.bf16.msra.mxu0 %v1105_v25  ;;  %v627_v25 = vld [vmem:[#allocation10 + $0x98] sm:$0xff] }
  0x7b   :  { %527 = vmatprep.subr.bf16.mxu1 %v1074_v13  ;;  %500 = vmatprep.subr.bf16.mxu0 %v1113_v47  ;;  %v630_v47 = vld [vmem:[#allocation10 + $0xb0] sm:$0xff] }
  0x7e   :  { %501 = vmatpush1.bf16.msra.mxu0 %v1111_v49  ;;  %v631_v49 = vld [vmem:[#allocation10 + $0xb8] sm:$0xff] }
  0x7f   :  { %982 = vmatprep.subr.bf16.mxu0 %v981_v22  ;;  %v999_v22 = vpack.c.bf16 %v617_v20, %v616_v19 }
 0x134   :  { %v151_v27 = vpop.f32.mrb[0].mxu0 }
 0x135   :  { %v152_v28 = vadd.f32 %v830_v26, %v151_v27  ;;  %v959_v29 = vpop.f32.mrb[1].mxu0  ;;  %v983_v26 = vpack.c.bf16 %v609_v23, %v608_v21  ;;  %v985_v27 = vpack.c.bf16 %v627_v25, %v626_v24  ;;  %v646_v21 = vld [vmem:[#allocation10 + $0x130] sm:$0xff]  ;;  %v647_v23 = vld [vmem:[#allocation10 + $0x138] sm:$0xff] }
 0x136   :  { %v154_v30 = vpop.f32.mrb[2].mxu0  ;;  %v657_v29 = vld [vmem:[#allocation10 + $0x188] sm:$0xff]  ;;  %v1027_v24 = vpack.c.bf16 %v647_v23, %v646_v21  ;;  %v634_v25 = vld [vmem:[#allocation10 + $0xd0] sm:$0xff] }
 0x137   :  { %v157_v31 = vmax.f32 %v152_v28, 0.0  ;;  %v960_v32 = vpop.f32.mrb[3].mxu0  ;;  %v656_v28 = vld [vmem:[#allocation10 + $0x180] sm:$0xff]  ;;  %v610_v30 = vld [vmem:[#allocation10 + $0x10] sm:$0xff] }
 0x138   :  { %v611_v32 = vld [vmem:[#allocation10 + $0x18] sm:$0xff] }
 0x139   :  { %v158_v34 = vpack.c.bf16 %v157_v31, %v157_v31  ;;  %v1013_v31 = vpack.c.bf16 %v657_v29, %v656_v28  ;;  %v665_v29 = vld [vmem:[#allocation10 + $0x1c8] sm:$0xff] }
 0x13b   :  { %978 = vmatmul.mubr.bf16.vlgmr.msra.gmra.mrb[0].mxu1 %v158_v34  ;;  %v641_v34 = vld [vmem:[#allocation10 + $0x108] sm:$0xff] }
 0x13c   :  { %528 = vmatpush1.bf16.msra.mxu1 %v1072_v33  ;;  %559 = vmatprep.mubr.bf16.mxu1 %v1286_v51  ;;  %v640_v33 = vld [vmem:[#allocation10 + $0x100] sm:$0xff]  ;;  %v661_v51 = vld [vmem:[#allocation10 + $0x1a8] sm:$0xff] }
 0x13d   :  { %529 = vmatprep.subr.bf16.mxu1 %v1080_v35  ;;  %v987_v35 = vpack.c.bf16 %v611_v32, %v610_v30  ;;  %v618_v30 = vld [vmem:[#allocation10 + $0x50] sm:$0xff] }
 0x140   :  { %530 = vmatpush1.bf16.msra.mxu1 %v1078_v36  ;;  %v1015_v36 = vpack.c.bf16 %v641_v34, %v640_v33  ;;  %v648_v34 = vld [vmem:[#allocation10 + $0x140] sm:$0xff] }
 0x141   :  { %531 = vmatprep.subr.bf16.mxu1 %v1086_v37  ;;  %v628_v37 = vld [vmem:[#allocation10 + $0xa0] sm:$0xff] }
 0x144   :  { %532 = vmatpush1.bf16.msra.mxu1 %v1084_v38  ;;  %v629_v38 = vld [vmem:[#allocation10 + $0xa8] sm:$0xff] }
 0x145   :  { %533 = vmatprep.subr.bf16.mxu1 %v1092_v39  ;;  %v658_v39 = vld [vmem:[#allocation10 + $0x190] sm:$0xff] }
 0x148   :  { %534 = vmatpush1.bf16.msra.mxu1 %v1090_v40  ;;  %v989_v40 = vpack.c.bf16 %v629_v38, %v628_v37  ;;  %v636_v37 = vld [vmem:[#allocation10 + $0xe0] sm:$0xff]  ;;  %v637_v38 = vld [vmem:[#allocation10 + $0xe8] sm:$0xff] }
 0x149   :  { %535 = vmatprep.subr.bf16.mxu1 %v1098_v41  ;;  %v659_v41 = vld [vmem:[#allocation10 + $0x198] sm:$0xff] }
 0x14c   :  { %536 = vmatpush1.bf16.msra.mxu1 %v1096_v42  ;;  %v612_v42 = vld [vmem:[#allocation10 + $0x20] sm:$0xff] }
 0x14d   :  { %537 = vmatprep.subr.bf16.mxu1 %v1104_v43  ;;  %v613_v43 = vld [vmem:[#allocation10 + $0x28] sm:$0xff] }
 0x150   :  { %538 = vmatpush1.bf16.msra.mxu1 %v1102_v44  ;;  %v1017_v44 = vpack.c.bf16 %v659_v41, %v658_v39  ;;  %v666_v39 = vld [vmem:[#allocation10 + $0x1d0] sm:$0xff]  ;;  %v667_v41 = vld [vmem:[#allocation10 + $0x1d8] sm:$0xff] }
 0x151   :  { %539 = vmatprep.subr.bf16.mxu1 %v1110_v45  ;;  %v642_v45 = vld [vmem:[#allocation10 + $0x110] sm:$0xff] }
 0x154   :  { %540 = vmatpush1.bf16.msra.mxu1 %v1108_v46  ;;  %v643_v46 = vld [vmem:[#allocation10 + $0x118] sm:$0xff] }
 0x155   :  { %541 = vmatprep.subr.bf16.mxu1 %v1116_v48  ;;  %v1019_v48 = vpack.c.bf16 %v643_v46, %v642_v45  ;;  %v650_v46 = vld [vmem:[#allocation10 + $0x150] sm:$0xff] }
 0x158   :  { %542 = vmatpush1.bf16.msra.mxu1 %v1114_v50  ;;  %v660_v50 = vld [vmem:[#allocation10 + $0x1a0] sm:$0xff] }
 0x159   :  { %1014 = vmatprep.subr.bf16.mxu1 %v1013_v31  ;;  %v619_v31 = vld [vmem:[#allocation10 + $0x58] sm:$0xff] }
 0x15a   :  { %v1003_v33 = vpack.c.bf16 %v619_v31, %v618_v30 }
 0x20e   :  { %v264_v53 = vpop.f32.mrb[0].mxu1 }
 0x20f   :  { %v265_v54 = vadd.f32 %v833_v52, %v264_v53  ;;  %v979_v55 = vpop.f32.mrb[1].mxu1  ;;  %v991_v52 = vpack.c.bf16 %v613_v43, %v612_v42  ;;  %v1021_v53 = vpack.c.bf16 %v661_v51, %v660_v50  ;;  %v620_v42 = vld [vmem:[#allocation10 + $0x60] sm:$0xff]  ;;  %v621_v43 = vld [vmem:[#allocation10 + $0x68] sm:$0xff]  ;;  %v639_v50 = vld [vmem:[#allocation10 + $0xf8] sm:$0xff] }
 0x210   :  { %v267_v56 = vpop.f32.mrb[2].mxu1  ;;  %v1007_v45 = vpack.c.bf16 %v621_v43, %v620_v42 }
 0x211   :  { %v270_v57 = vmax.f32 %v265_v54, 0.0  ;;  %v980_v58 = vpop.f32.mrb[3].mxu1  ;;  %v993_v54 = vpack.c.bf16 %v631_v49, %v630_v47  ;;  %v651_v47 = vld [vmem:[#allocation10 + $0x158] sm:$0xff] }
 0x212   :  { %v1035_v49 = vpack.c.bf16 %v651_v47, %v650_v46 }
 0x213   :  { %v271_v59 = vpack.c.bf16 %v270_v57, %v270_v57 }
 0x215   :  { %519 = vmatmul.mubr.bf16.vlgmr.msra.gmra.mrb[4].mxu0 %v271_v59  ;;  %560 = vmatmul.mubr.bf16.vlgmr.msra.gmra.mrb[4].mxu1 %v271_v59 }
 0x216   :  { %984 = vmatpush3.bf16.msra.mxu0 %v983_v26  ;;  %1016 = vmatpush3.bf16.msra.mxu1 %v1015_v36  ;;  %v635_v26 = vld [vmem:[#allocation10 + $0xd8] sm:$0xff] }
 0x217   :  { %986 = vmatprep.subr.bf16.mxu0 %v985_v27  ;;  %1018 = vmatprep.subr.bf16.mxu1 %v1017_v44  ;;  %v664_v27 = vld [vmem:[#allocation10 + $0x1c0] sm:$0xff]  ;;  %v1001_v28 = vpack.c.bf16 %v635_v26, %v634_v25  ;;  %v1033_v44 = vpack.c.bf16 %v667_v41, %v666_v39 }
 0x218   :  { %v1029_v32 = vpack.c.bf16 %v665_v29, %v664_v27 }
 0x21a   :  { %988 = vmatpush3.bf16.msra.mxu0 %v987_v35  ;;  %1020 = vmatpush3.bf16.msra.mxu1 %v1019_v48  ;;  %v649_v35 = vld [vmem:[#allocation10 + $0x148] sm:$0xff]  ;;  %v638_v48 = vld [vmem:[#allocation10 + $0xf0] sm:$0xff] }
 0x21b   :  { %990 = vmatprep.subr.bf16.mxu0 %v989_v40  ;;  %1022 = vmatprep.subr.bf16.mxu1 %v1021_v53  ;;  %v1031_v36 = vpack.c.bf16 %v649_v35, %v648_v34  ;;  %v1005_v40 = vpack.c.bf16 %v637_v38, %v636_v37  ;;  %v1009_v51 = vpack.c.bf16 %v639_v50, %v638_v48  ;;  %v669_v53 = vld [vmem:[#allocation10 + $0x1e8] sm:$0xff] }
 0x21e   :  { %992 = vmatpush3.bf16.msra.mxu0 %v991_v52  ;;  %v668_v52 = vld [vmem:[#allocation10 + $0x1e0] sm:$0xff] }
 0x21f   :  { %994 = vmatprep.subr.bf16.mxu0 %v993_v54  ;;  %v1037_v54 = vpack.c.bf16 %v669_v53, %v668_v52 }
 0x2e8   :  { %v520_v5 = vpop.f32.mrb[4].mxu0  ;;  %v561_v6 = vpop.f32.mrb[4].mxu1 }
 0x2e9   :  { %v1415_v7 = vadd.f32 %v520_v5, %v309_v1  ;;  %v522_v9 = vpop.f32.mrb[5].mxu0  ;;  %v563_v10 = vpop.f32.mrb[5].mxu1  ;;  %v1421_v17 = vadd.f32 %v561_v6, %v317_v8  ;;  %v615_v8 = vld [vmem:[#allocation10 + $0x38] sm:$0xff] }
 0x2ea   :  { %v1417_v11 = vadd.f32 %v522_v9, %v313_v3  ;;  %v524_v13 = vpop.f32.mrb[6].mxu0  ;;  %v565_v14 = vpop.f32.mrb[6].mxu1  ;;  %v564_v18 = vadd.f32 %v563_v10, %v321_v12  ;;  %v644_v9 = vld [vmem:[#allocation10 + $0x120] sm:$0xff] }
 0x2eb   :  { %v525_v15 = vpop.f32.mrb[7].mxu0  ;;  %v566_v16 = vpop.f32.mrb[7].mxu1  ;;  %568 = vmax.xlane.f32.xlu1 %v1415_v7  ;;  %v632_v13 = vld [vmem:[#allocation10 + $0xc0] sm:$0xff]  ;;  %v633_v14 = vld [vmem:[#allocation10 + $0xc8] sm:$0xff] }
 0x2ec   :  { %578 = vmax.xlane.f32.xlu0 %v1417_v11  ;;  %v662_v15 = vld [vmem:[#allocation10 + $0x1b0] sm:$0xff]  ;;  %v997_v16 = vpack.c.bf16 %v633_v14, %v632_v13 }
 0x2ef   :  { %588 = vmax.xlane.f32.xlu1 %v1421_v17 }
 0x2f0   :  { %598 = vmax.xlane.f32.xlu0 %v564_v18 }
 0x378   :  { %v569_v55 = vpop.xlane.xlu1 %568 }
 0x379   :  { %v570_v56 = vsub.f32 %v1415_v7, %v569_v55  ;;  %v579_v57 = vpop.xlane.xlu0 %578  ;;  %v614_v7 = vld [vmem:[#allocation10 + $0x30] sm:$0xff] }
 0x37a   :  { %v580_v58 = vsub.f32 %v1417_v11, %v579_v57  ;;  %v995_v10 = vpack.c.bf16 %v615_v8, %v614_v7  ;;  %v645_v11 = vld [vmem:[#allocation10 + $0x128] sm:$0xff]  ;;  %v622_v55 = vld [vmem:[#allocation10 + $0x70] sm:$0xff]  ;;  %v652_v57 = vld [vmem:[#allocation10 + $0x160] sm:$0xff] }
 0x37b   :  { %v571_v61 = vmul.f32 1.442695, %v570_v56  ;;  %v1023_v12 = vpack.c.bf16 %v645_v11, %v644_v9  ;;  %v623_v56 = vld [vmem:[#allocation10 + $0x78] sm:$0xff] }
 0x37c   :  { %v581_v59 = vmul.f32 1.442695, %v580_v58  ;;  %v589_v60 = vpop.xlane.xlu1 %588  ;;  %996 = vmatpush3.bf16.msra.mxu0 %v995_v10  ;;  %v1011_v58 = vpack.c.bf16 %v623_v56, %v622_v55 }
 0x37d   :  { %v599_v62 = vpop.xlane.xlu0 %598  ;;  %v590_v63 = vsub.f32 %v1421_v17, %v589_v60  ;;  %1024 = vmatpush3.bf16.msra.mxu1 %v1023_v12  ;;  %v663_v17 = vld [vmem:[#allocation10 + $0x1b8] sm:$0xff]  ;;  %998 = vmatprep.subr.bf16.mxu0 %v997_v16 }
 0x37e   :  { %1117 = vpow2.f32 %v581_v59  ;;  %v600_v0 = vsub.f32 %v564_v18, %v599_v62  ;;  %v1025_v18 = vpack.c.bf16 %v663_v17, %v662_v15  ;;  %v653_v59 = vld [vmem:[#allocation10 + $0x168] sm:$0xff]  ;;  %v671_v62 = vld [vmem:[#allocation10 + $0x1f8] sm:$0xff] }
 0x37f   :  { %1119 = vpow2.f32 %v571_v61  ;;  %v591_v2 = vmul.f32 1.442695, %v590_v63  ;;  %v1039_v60 = vpack.c.bf16 %v653_v59, %v652_v57  ;;  %v670_v61 = vld [vmem:[#allocation10 + $0x1f0] sm:$0xff] }
 0x380   :  { %v601_v1 = vmul.f32 1.442695, %v600_v0  ;;  %1026 = vmatprep.subr.bf16.mxu1 %v1025_v18  ;;  %1000 = vmatpush3.bf16.msra.mxu0 %v999_v22  ;;  %v1041_v63 = vpack.c.bf16 %v671_v62, %v670_v61  ;;  %v654_v0 = vld [vmem:[#allocation10 + $0x170] sm:$0xff] }
 0x381   :  { %1028 = vmatpush3.bf16.msra.mxu1 %v1027_v24  ;;  %1002 = vmatprep.subr.bf16.mxu0 %v1001_v28 }
 0x382   :  { %1121 = vpow2.f32 %v601_v1  ;;  %1030 = vmatprep.subr.bf16.mxu1 %v1029_v32  ;;  %v655_v1 = vld [vmem:[#allocation10 + $0x178] sm:$0xff] }
 0x383   :  { %1123 = vpow2.f32 %v591_v2  ;;  %v1043_v2 = vpack.c.bf16 %v655_v1, %v654_v0 }
 0x384   :  { %1004 = vmatpush3.bf16.msra.mxu0 %v1003_v33 }
 0x385   :  { %1032 = vmatpush3.bf16.msra.mxu1 %v1031_v36  ;;  %1006 = vmatprep.subr.bf16.mxu0 %v1005_v40 }
 0x386   :  { %1034 = vmatprep.subr.bf16.mxu1 %v1033_v44 }
 0x388   :  { %v1427_v3 = vpop.eup %1117  ;;  %1008 = vmatpush3.bf16.msra.mxu0 %v1007_v45 }
 0x389   :  { %583 = vadd.xlane.f32.xlu0 %v1427_v3  ;;  %v1430_v4 = vpop.eup %1119  ;;  %1036 = vmatpush3.bf16.msra.mxu1 %v1035_v49 }
 0x38a   :  { %1010 = vmatprep.subr.bf16.mxu0 %v1009_v51  ;;  %1038 = vmatprep.subr.bf16.mxu1 %v1037_v54 }
 0x38c   :  { %v1432_v5 = vpop.eup %1121  ;;  %1012 = vmatpush3.bf16.msra.mxu0 %v1011_v58 }
 0x38d   :  { %603 = vadd.xlane.f32.xlu1 %v1432_v5  ;;  %573 = vadd.xlane.f32.xlu0 %v1430_v4  ;;  %v1436_v6 = vpop.eup %1123 }
 0x38e   :  { %1040 = vmatpush3.bf16.msra.mxu1 %v1039_v60 }
 0x38f   :  { %1042 = vmatprep.subr.bf16.mxu1 %v1041_v63 }
 0x391   :  { %593 = vadd.xlane.f32.xlu1 %v1436_v6 }
 0x392   :  { %1044 = vmatpush3.bf16.msra.mxu1 %v1043_v2 }
 0x416   :  { %v584_v7 = vpop.xlane.xlu0 %583 }
 0x417   :  { %1125 = vrcp.f32 %v584_v7 }
 0x41a   :  { %v574_v8 = vpop.xlane.xlu0 %573  ;;  %v604_v9 = vpop.xlane.xlu1 %603 }
 0x41b   :  { %1127 = vrcp.f32 %v574_v8 }
 0x41c   :  { %1129 = vrcp.f32 %v604_v9 }
 0x41e   :  { %v594_v10 = vpop.xlane.xlu1 %593 }
 0x41f   :  { %1131 = vrcp.f32 %v594_v10 }
 0x421   :  { %v1126_v11 = vpop.eup %1125 }
 0x422   :  { %v586_v12 = vmul.f32 %v1126_v11, %v1427_v3 }
 0x424   :  { %v587_v13 = vmax.f32 %v586_v12, 0.001 }
 0x425   :  { %v1128_v14 = vpop.eup %1127 }
 0x426   :  { %v1130_v15 = vpop.eup %1129  ;;  %736 = vmatprep.mubr.f32.mxu0 %v587_v13  ;;  %v576_v16 = vmul.f32 %v1128_v14, %v1430_v4 }
 0x427   :  { %v606_v17 = vmul.f32 %v1130_v15, %v1432_v5 }
 0x428   :  { %v577_v18 = vmax.f32 %v576_v16, 0.001 }
 0x429   :  { %v1132_v19 = vpop.eup %1131  ;;  %v607_v20 = vmax.f32 %v606_v17, 0.001 }
 0x42a   :  { %737 = vmatmul.mubr.f32.vlgmr.msra.gmra.mrb[8].mxu0 %v577_v18  ;;  %v596_v21 = vmul.f32 %v1132_v19, %v1436_v6 }
 0x42b   :  { %806 = vmatprep.mubr.f32.mxu1 %v607_v20 }
 0x42c   :  { %v597_v22 = vmax.f32 %v596_v21, 0.001 }
 0x42e   :  { %807 = vmatmul.mubr.f32.vlgmr.msra.gmra.mrb[8].mxu1 %v597_v22 }
 0x4fd   :  { %v917_v23 = vpop.f32.mrb[8].mxu0 }
 0x4fe   :  { %v918_v24 = vpop.f32.mrb[9].mxu0 }
 0x4ff   :  { %v919_v3 = vadd.f32 %v918_v24, %v917_v23 }
 0x501   :  { %v952_v25 = vpop.f32.mrb[8].mxu1 }
 0x502   :  { %v953_v26 = vpop.f32.mrb[9].mxu1 }
 0x503   :  { %v954_v27 = vadd.f32 %v953_v26, %v952_v25 }
 0x505   :  { %v809_v4 = vadd.f32 %v954_v27, %v919_v3 }
 0x507   :  { %812 = vst [vmem:[#allocation11] sm:$0xff] %v809_v4 }
 0x508   :  { %1254 = shalt.err (!%p1251_p2)
}
 0x509   :  { %s1255_s28 = scalar_lea.hbm %s1463_s8, 128 }
 0x50a   :  { %p1256_p3 = scmp.ne.s32.totalorder %s1463_s8, %s1255_s28  ;;  %p1259_p4 = scmp.lt.u32.totalorder %s1255_s28, %s1463_s8 }
 0x50c   :  { %p1261_p5 = pnand %p1259_p4, %p1256_p3 }
 0x50e   :  { %1264 = shalt.err (!%p1261_p5)
}
 0x50f   :  { %822 = dma.vmem_to_hbm [thread:$0]  %s820_s6, 128, %s1463_s8, [#allocation4]  }
 0x510   :  { %1271 = dma.done.wait [#allocation4], 128  }
 0x511   :  { %1272 = vsyncadd [#allocation4], 4294967168 }
 0x512   :  { %826 = vsyncpa [#allocation3], 1 }
 0x513   :  { %827 = vsyncpa [#allocation6], 1 }
 0x514   :  { %828 = vsyncpa [#allocation9], 1 }
 0x515   :  { %829 = vsyncpa [#allocation4], 1 }

</bundles_post_ra>
